<compile_context>
chip_gen: v7x
topology: tpu7x:2x2x1
jax: 0.10.0
libtpu: 0.0.40
codegen_flags: <defaults>
</compile_context>

<pallas_src>
import jax
import jax.numpy as jnp
from jax import lax
from jax.experimental import pallas as pl
from jax.experimental.pallas import tpu as pltpu


def gcn_discriminator_forward(kp, params, parent_ids, child_ids,
                              use_self_loop=True, batch_block=8):
    B, N, C = kp.shape
    E = len(parent_ids)
    D = params["w_in"].shape[1]
    CP = 8                                    # keypoint channels padded to one sublane tile

    # --- batch blocking -----------------------------------------------------
    bblk = max(1, min(batch_block, B))
    if bblk < B:
        # multi-block: keep the (bblk, 1) output blocks 8-row aligned
        bblk = max(8, (bblk // 8) * 8)
    num_blocks = -(-B // bblk)
    b_pad = num_blocks * bblk
    if b_pad != B:
        # replicate the last element so padded rows stay finite (results dropped)
        kp = jnp.concatenate([kp, jnp.repeat(kp[-1:], b_pad - B, axis=0)], axis=0)

    BN = bblk * N                              # nodes per grid step
    E2 = 2 * bblk * E                          # signed-incidence rows per grid step

    # --- host-side block-diagonal incidence constants ------------------------
    pm = jax.nn.one_hot(jnp.asarray(parent_ids, jnp.int32), N, dtype=jnp.float32)  # (E, N)
    cm = jax.nn.one_hot(jnp.asarray(child_ids, jnp.int32), N, dtype=jnp.float32)   # (E, N)
    eye_b = jnp.eye(bblk, dtype=jnp.float32)

    d2_bd = jnp.kron(eye_b, jnp.concatenate([pm - cm, cm - pm], axis=0))  # (E2, BN)
    t_bd = jnp.kron(eye_b, jnp.concatenate([cm, pm], axis=0))             # (E2, BN)
    st_bd = jnp.kron(eye_b, jnp.concatenate([pm, cm], axis=0).T)          # (BN, E2)
    pool = jnp.kron(eye_b, jnp.ones((1, N), jnp.float32))                 # (bblk, BN)

    # --- packed parameter slab (lane width D, 8-row-aligned sections) --------
    w_in_p = jnp.zeros((CP, D), jnp.float32).at[:C].set(params["w_in"])
    wh_t = jnp.tile(params["wh"], (bblk, 1))                              # (BN, D)
    bias_blk = (jnp.zeros((8, D), jnp.float32)
                .at[0].set(params["b_in"][0])
                .at[1].set(params["b1"][0])
                .at[2].set(params["b2"][0]))
    prm = jnp.concatenate([w_in_p, params["w1"], params["w2"], wh_t, bias_blk],
                          axis=0)                                          # (CP+2D+BN+8, D)
    off_w1 = CP
    off_w2 = CP + D
    off_wh = CP + 2 * D
    off_b = CP + 2 * D + BN

    # --- keypoints, flattened to 2-D and channel-padded ----------------------
    kp_flat = jnp.zeros((b_pad * N, CP), jnp.float32).at[:, :C].set(
        kp.reshape(b_pad * N, C))

    # --- kernel ---------------------------------------------------------------
    def kernel(kp_ref, d2_ref, t_ref, st_ref, pool_ref, prm_ref, out_ref):
        kp_blk = kp_ref[...]                                  # (BN, CP)

        w_in = prm_ref[0:CP, :]                               # (CP, D)
        w1 = prm_ref[off_w1:off_w1 + D, :]                    # (D, D)
        w2 = prm_ref[off_w2:off_w2 + D, :]                    # (D, D)
        wh = prm_ref[off_wh:off_wh + BN, :]                   # (BN, D)
        bias = prm_ref[off_b:off_b + 8, :]                    # (8, D)
        b_in = bias[0:1, :]
        b1 = bias[1:2, :]
        b2 = bias[2:3, :]

        # bone vectors & inverse lengths (zero-padded channels contribute 0)
        diff = jnp.dot(d2_ref[...], kp_blk, preferred_element_type=jnp.float32)  # (E2, CP)
        inv = lax.rsqrt(jnp.sum(diff * diff, axis=-1, keepdims=True))            # (E2, 1)

        t = t_ref[...]                                        # (E2, BN)
        st = st_ref[...]                                      # (BN, E2)

        def prop(v):  # A @ v without materializing A
            av = jnp.dot(st, inv * jnp.dot(t, v, preferred_element_type=jnp.float32),
                         preferred_element_type=jnp.float32)
            return av + v if use_self_loop else av

        # input_layer: Linear(disc_sup_dim -> input_dim) on all nodes at once
        x = jnp.dot(kp_blk, w_in, preferred_element_type=jnp.float32) + b_in

        # two GCN_simple layers: H = relu(A X W + b)
        h = jnp.maximum(
            jnp.dot(prop(x), w1, preferred_element_type=jnp.float32) + b1, 0.0)
        h = jnp.maximum(
            jnp.dot(prop(h), w2, preferred_element_type=jnp.float32) + b2, 0.0)

        # header (bias added in the wrapper): per-batch sum of h * Wh
        tmp = jnp.dot(pool_ref[...], h * wh, preferred_element_type=jnp.float32)  # (bblk, D)
        out_ref[...] = jnp.sum(tmp, axis=-1, keepdims=True)                       # (bblk, 1)

    full = lambda g: (0, 0)

    flops_per_step = (2 * E2 * BN * CP                 # bone vectors
                      + 2 * BN * CP * D                # input layer
                      + 2 * (4 * E2 * BN * D)          # two factored A-applications
                      + 2 * (2 * BN * D * D)           # two layer weight matmuls
                      + 2 * bblk * BN * D + 2 * BN * D)  # header
    bytes_accessed = 4 * int(kp_flat.size + d2_bd.size + t_bd.size + st_bd.size
                             + pool.size + prm.size + b_pad)
    cost = pl.CostEstimate(flops=num_blocks * flops_per_step,
                           transcendentals=num_blocks * E2,
                           bytes_accessed=bytes_accessed)

    out = pl.pallas_call(
        kernel,
        out_shape=jax.ShapeDtypeStruct((b_pad, 1), jnp.float32),
        grid=(num_blocks,),
        in_specs=[
            pl.BlockSpec((BN, CP), lambda g: (g, 0)),   # stacked keypoints (one batch block)
            pl.BlockSpec(d2_bd.shape, full),            # signed incidence (block diagonal)
            pl.BlockSpec(t_bd.shape, full),             # T = [cm; pm] (block diagonal)
            pl.BlockSpec(st_bd.shape, full),            # S^T = [pm; cm]^T (block diagonal)
            pl.BlockSpec(pool.shape, full),             # per-batch node pooling matrix
            pl.BlockSpec(prm.shape, full),              # packed parameter slab
        ],
        out_specs=pl.BlockSpec((bblk, 1), lambda g: (g, 0)),
        compiler_params=pltpu.CompilerParams(dimension_semantics=("parallel",)),
        cost_estimate=cost,
    )(kp_flat, d2_bd, t_bd, st_bd, pool, prm)

    # header bias is a (1,1) scalar: keep it off the vector path.
    return out[:B] + params["bh"]


def reference_forward(kp, params, parent_ids, child_ids, use_self_loop=True):
    """Pure-JAX reference mirroring the module math (for correctness check)."""
    B, N, C = kp.shape
    pm = jax.nn.one_hot(jnp.asarray(parent_ids, jnp.int32), N, dtype=jnp.float32)
    cm = jax.nn.one_hot(jnp.asarray(child_ids, jnp.int32), N, dtype=jnp.float32)

    def single(k):
        end = pm @ k
        start = cm @ k
        dist = jnp.sqrt(jnp.sum((end - start) ** 2, axis=-1, keepdims=True))
        inv = 1.0 / dist
        adj = pm.T @ (inv * cm) + cm.T @ (inv * pm)
        if use_self_loop:
            adj = adj + jnp.eye(N, dtype=jnp.float32)
        x = k @ params["w_in"] + params["b_in"]
        h = jnp.maximum(adj @ x @ params["w1"] + params["b1"], 0.0)
        h = jnp.maximum(adj @ h @ params["w2"] + params["b2"], 0.0)
        return jnp.sum(h * params["wh"], keepdims=True) + params["bh"]

    return jax.vmap(single)(kp)[:, 0, :]


if __name__ == "__main__":
    # cfg: name='simple_gcn', disc_sup_dim=3, input_dim=hidden_dim=output_dim=32,
    # num_node=16, use_self_loop=True  (equal dims required by the Sequential stacking).
    B, N, C, D = 2, 16, 3, 32
    use_self_loop = True

    # chain skeleton: node i is parent of node i+1
    parent_ids = list(range(N - 1))
    child_ids = list(range(1, N))

    key = jax.random.PRNGKey(0)
    ks = jax.random.split(key, 10)
    keypoints = jax.random.normal(ks[0], (B, N, C), jnp.float32)

    params = {
        "w_in": jax.random.normal(ks[1], (C, D), jnp.float32) * 0.1,
        "b_in": jax.random.normal(ks[2], (1, D), jnp.float32) * 0.1,
        "w1":   jax.random.normal(ks[3], (D, D), jnp.float32) * 0.1,
        "b1":   jax.random.normal(ks[4], (1, D), jnp.float32) * 0.1,
        "w2":   jax.random.normal(ks[5], (D, D), jnp.float32) * 0.1,
        "b2":   jax.random.normal(ks[6], (1, D), jnp.float32) * 0.1,
        # header Linear(N*D -> 1): weight stored already reshaped to (N, D)
        "wh":   jax.random.normal(ks[7], (N, D), jnp.float32) * 0.1,
        "bh":   jax.random.normal(ks[8], (1, 1), jnp.float32) * 0.1,
    }

    out = gcn_discriminator_forward(keypoints, params, parent_ids, child_ids,
                                    use_self_loop=use_self_loop)
    out = jax.block_until_ready(out)

    ref = reference_forward(keypoints, params, parent_ids, child_ids,
                            use_self_loop=use_self_loop)
    assert out.shape == (B, 1), out.shape
    assert jnp.allclose(out, ref, atol=1e-4, rtol=1e-4), (out, ref)

    print("KERNEL_OK")
</pallas_src>

<mosaic_0001>
module attributes {stable_mosaic.version = 11 : i64} {
  func.func @kernel(%arg0: i32, %arg1: memref<32x8xf32, #tpu.memory_space<vmem>>, %arg2: memref<60x32xf32, #tpu.memory_space<vmem>>, %arg3: memref<60x32xf32, #tpu.memory_space<vmem>>, %arg4: memref<32x60xf32, #tpu.memory_space<vmem>>, %arg5: memref<2x32xf32, #tpu.memory_space<vmem>>, %arg6: memref<112x32xf32, #tpu.memory_space<vmem>>, %arg7: memref<2x1xf32, #tpu.memory_space<vmem>>) attributes {dimension_semantics = [#tpu.dimension_semantics<parallel>], iteration_bounds = array<i64: 1>, scalar_prefetch = 0 : i64, scratch_operands = 0 : i64, tpu.core_type = #tpu.core_type<tc>, window_params = [{transform_indices = @transform_0, window_bounds = array<i64: 32, 8>}, {pipeline_mode = #tpu.pipeline_mode<synchronous>, transform_indices = @transform_1, window_bounds = array<i64: 60, 32>}, {pipeline_mode = #tpu.pipeline_mode<synchronous>, transform_indices = @transform_2, window_bounds = array<i64: 60, 32>}, {pipeline_mode = #tpu.pipeline_mode<synchronous>, transform_indices = @transform_3, window_bounds = array<i64: 32, 60>}, {pipeline_mode = #tpu.pipeline_mode<synchronous>, transform_indices = @transform_4, window_bounds = array<i64: 2, 32>}, {pipeline_mode = #tpu.pipeline_mode<synchronous>, transform_indices = @transform_5, window_bounds = array<i64: 112, 32>}, {transform_indices = @transform_6, window_bounds = array<i64: 2, 1>}]} {
    %c0 = arith.constant 0 : index
    %c0_0 = arith.constant 0 : index
    %0 = vector.load %arg1[%c0, %c0_0] : memref<32x8xf32, #tpu.memory_space<vmem>>, vector<32x8xf32>
    %c0_1 = arith.constant 0 : index
    %c0_2 = arith.constant 0 : index
    %1 = vector.load %arg6[%c0_1, %c0_2] : memref<112x32xf32, #tpu.memory_space<vmem>>, vector<8x32xf32>
    %c8 = arith.constant 8 : index
    %c0_3 = arith.constant 0 : index
    %2 = vector.load %arg6[%c8, %c0_3] : memref<112x32xf32, #tpu.memory_space<vmem>>, vector<32x32xf32>
    %c40 = arith.constant 40 : index
    %c0_4 = arith.constant 0 : index
    %3 = vector.load %arg6[%c40, %c0_4] : memref<112x32xf32, #tpu.memory_space<vmem>>, vector<32x32xf32>
    %c72 = arith.constant 72 : index
    %c0_5 = arith.constant 0 : index
    %4 = vector.load %arg6[%c72, %c0_5] : memref<112x32xf32, #tpu.memory_space<vmem>>, vector<32x32xf32>
    %c104 = arith.constant 104 : index
    %c0_6 = arith.constant 0 : index
    %5 = vector.load %arg6[%c104, %c0_6] : memref<112x32xf32, #tpu.memory_space<vmem>>, vector<8x32xf32>
    %6 = vector.extract_strided_slice %5 {offsets = [0, 0], sizes = [1, 32], strides = [1, 1]} : vector<8x32xf32> to vector<1x32xf32>
    %7 = vector.extract_strided_slice %5 {offsets = [1, 0], sizes = [1, 32], strides = [1, 1]} : vector<8x32xf32> to vector<1x32xf32>
    %8 = vector.extract_strided_slice %5 {offsets = [2, 0], sizes = [1, 32], strides = [1, 1]} : vector<8x32xf32> to vector<1x32xf32>
    %c0_7 = arith.constant 0 : index
    %c0_8 = arith.constant 0 : index
    %9 = vector.load %arg2[%c0_7, %c0_8] : memref<60x32xf32, #tpu.memory_space<vmem>>, vector<60x32xf32>
    %cst = arith.constant dense<0.000000e+00> : vector<60x8xf32>
    %10 = tpu.matmul %9, %0, %cst {dimension_numbers = #tpu.dot_dimension_numbers<[1], [0], [0], [1], [0, 0, 1, 1], [], []>} : vector<60x32xf32>, vector<32x8xf32>, vector<60x8xf32> -> vector<60x8xf32>
    %11 = arith.mulf %10, %10 : vector<60x8xf32>
    %cst_9 = arith.constant dense<0.000000e+00> : vector<60xf32>
    %12 = vector.multi_reduction <add>, %11, %cst_9 [1] : vector<60x8xf32> to vector<60xf32>
    %13 = vector.shape_cast %12 : vector<60xf32> to vector<60x1xf32>
    %14 = math.rsqrt %13 : vector<60x1xf32>
    %c0_10 = arith.constant 0 : index
    %c0_11 = arith.constant 0 : index
    %15 = vector.load %arg3[%c0_10, %c0_11] : memref<60x32xf32, #tpu.memory_space<vmem>>, vector<60x32xf32>
    %c0_12 = arith.constant 0 : index
    %c0_13 = arith.constant 0 : index
    %16 = vector.load %arg4[%c0_12, %c0_13] : memref<32x60xf32, #tpu.memory_space<vmem>>, vector<32x60xf32>
    %cst_14 = arith.constant dense<0.000000e+00> : vector<32x32xf32>
    %17 = tpu.matmul %0, %1, %cst_14 {dimension_numbers = #tpu.dot_dimension_numbers<[1], [0], [0], [1], [0, 0, 1, 1], [], []>} : vector<32x8xf32>, vector<8x32xf32>, vector<32x32xf32> -> vector<32x32xf32>
    %18 = vector.broadcast %6 : vector<1x32xf32> to vector<32x32xf32>
    %19 = arith.addf %17, %18 : vector<32x32xf32>
    %cst_15 = arith.constant dense<0.000000e+00> : vector<60x32xf32>
    %20 = tpu.matmul %15, %19, %cst_15 {dimension_numbers = #tpu.dot_dimension_numbers<[1], [0], [0], [1], [0, 0, 1, 1], [], []>} : vector<60x32xf32>, vector<32x32xf32>, vector<60x32xf32> -> vector<60x32xf32>
    %21 = vector.broadcast %14 : vector<60x1xf32> to vector<60x32xf32>
    %22 = arith.mulf %21, %20 : vector<60x32xf32>
    %cst_16 = arith.constant dense<0.000000e+00> : vector<32x32xf32>
    %23 = tpu.matmul %16, %22, %cst_16 {dimension_numbers = #tpu.dot_dimension_numbers<[1], [0], [0], [1], [0, 0, 1, 1], [], []>} : vector<32x60xf32>, vector<60x32xf32>, vector<32x32xf32> -> vector<32x32xf32>
    %24 = arith.addf %23, %19 : vector<32x32xf32>
    %cst_17 = arith.constant dense<0.000000e+00> : vector<32x32xf32>
    %25 = tpu.matmul %24, %2, %cst_17 {dimension_numbers = #tpu.dot_dimension_numbers<[1], [0], [0], [1], [0, 0, 1, 1], [], []>} : vector<32x32xf32>, vector<32x32xf32>, vector<32x32xf32> -> vector<32x32xf32>
    %26 = vector.broadcast %7 : vector<1x32xf32> to vector<32x32xf32>
    %27 = arith.addf %25, %26 : vector<32x32xf32>
    %cst_18 = arith.constant 0.000000e+00 : f32
    %28 = vector.broadcast %cst_18 : f32 to vector<32x32xf32>
    %29 = arith.maximumf %27, %28 : vector<32x32xf32>
    %cst_19 = arith.constant dense<0.000000e+00> : vector<60x32xf32>
    %30 = tpu.matmul %15, %29, %cst_19 {dimension_numbers = #tpu.dot_dimension_numbers<[1], [0], [0], [1], [0, 0, 1, 1], [], []>} : vector<60x32xf32>, vector<32x32xf32>, vector<60x32xf32> -> vector<60x32xf32>
    %31 = vector.broadcast %14 : vector<60x1xf32> to vector<60x32xf32>
    %32 = arith.mulf %31, %30 : vector<60x32xf32>
    %cst_20 = arith.constant dense<0.000000e+00> : vector<32x32xf32>
    %33 = tpu.matmul %16, %32, %cst_20 {dimension_numbers = #tpu.dot_dimension_numbers<[1], [0], [0], [1], [0, 0, 1, 1], [], []>} : vector<32x60xf32>, vector<60x32xf32>, vector<32x32xf32> -> vector<32x32xf32>
    %34 = arith.addf %33, %29 : vector<32x32xf32>
    %cst_21 = arith.constant dense<0.000000e+00> : vector<32x32xf32>
    %35 = tpu.matmul %34, %3, %cst_21 {dimension_numbers = #tpu.dot_dimension_numbers<[1], [0], [0], [1], [0, 0, 1, 1], [], []>} : vector<32x32xf32>, vector<32x32xf32>, vector<32x32xf32> -> vector<32x32xf32>
    %36 = vector.broadcast %8 : vector<1x32xf32> to vector<32x32xf32>
    %37 = arith.addf %35, %36 : vector<32x32xf32>
    %cst_22 = arith.constant 0.000000e+00 : f32
    %38 = vector.broadcast %cst_22 : f32 to vector<32x32xf32>
    %39 = arith.maximumf %37, %38 : vector<32x32xf32>
    %c0_23 = arith.constant 0 : index
    %c0_24 = arith.constant 0 : index
    %40 = vector.load %arg5[%c0_23, %c0_24] : memref<2x32xf32, #tpu.memory_space<vmem>>, vector<2x32xf32>
    %41 = arith.mulf %39, %4 : vector<32x32xf32>
    %cst_25 = arith.constant dense<0.000000e+00> : vector<2x32xf32>
    %42 = tpu.matmul %40, %41, %cst_25 {dimension_numbers = #tpu.dot_dimension_numbers<[1], [0], [0], [1], [0, 0, 1, 1], [], []>} : vector<2x32xf32>, vector<32x32xf32>, vector<2x32xf32> -> vector<2x32xf32>
    %cst_26 = arith.constant dense<0.000000e+00> : vector<2xf32>
    %43 = vector.multi_reduction <add>, %42, %cst_26 [1] : vector<2x32xf32> to vector<2xf32>
    %44 = vector.shape_cast %43 : vector<2xf32> to vector<2x1xf32>
    %c0_27 = arith.constant 0 : index
    %c0_28 = arith.constant 0 : index
    %45 = vector.load %arg7[%c0_27, %c0_28] : memref<2x1xf32, #tpu.memory_space<vmem>>, vector<2x1xf32>
    tpu.vector_store %arg7[%c0_27, %c0_28], %44 {strides = array<i32>} : memref<2x1xf32, #tpu.memory_space<vmem>>, vector<2x1xf32>,
    return
  }
  func.func @transform_0(%arg0: i32) -> (i32, i32) {
    %c0_i32 = arith.constant 0 : i32
    %c0_i32_0 = arith.constant 0 : i32
    return %arg0, %c0_i32 : i32, i32
  }
  func.func @transform_1(%arg0: i32) -> (i32, i32) {
    %c0_i32 = arith.constant 0 : i32
    %c0_i32_0 = arith.constant 0 : i32
    %c0_i32_1 = arith.constant 0 : i32
    return %c0_i32, %c0_i32_0 : i32, i32
  }
  func.func @transform_2(%arg0: i32) -> (i32, i32) {
    %c0_i32 = arith.constant 0 : i32
    %c0_i32_0 = arith.constant 0 : i32
    %c0_i32_1 = arith.constant 0 : i32
    return %c0_i32, %c0_i32_0 : i32, i32
  }
  func.func @transform_3(%arg0: i32) -> (i32, i32) {
    %c0_i32 = arith.constant 0 : i32
    %c0_i32_0 = arith.constant 0 : i32
    %c0_i32_1 = arith.constant 0 : i32
    return %c0_i32, %c0_i32_0 : i32, i32
  }
  func.func @transform_4(%arg0: i32) -> (i32, i32) {
    %c0_i32 = arith.constant 0 : i32
    %c0_i32_0 = arith.constant 0 : i32
    %c0_i32_1 = arith.constant 0 : i32
    return %c0_i32, %c0_i32_0 : i32, i32
  }
  func.func @transform_5(%arg0: i32) -> (i32, i32) {
    %c0_i32 = arith.constant 0 : i32
    %c0_i32_0 = arith.constant 0 : i32
    %c0_i32_1 = arith.constant 0 : i32
    return %c0_i32, %c0_i32_0 : i32, i32
  }
  func.func @transform_6(%arg0: i32) -> (i32, i32) {
    %c0_i32 = arith.constant 0 : i32
    %c0_i32_0 = arith.constant 0 : i32
    return %arg0, %c0_i32 : i32, i32
  }
}

</mosaic_0001>

<bundles_post_ra>
// kernel: tpu_custom_call.1
= control target key start
LH: loop header
LB: loop body
LE: loop exit
PB: predicated region body
PF: predicated region fallthrough
CT: control target
= control target key end

     0   :  { %vm187_vm0 = vcmask 64512   ;;  %vm49_vm1 = vcmask 261120   ;;  %v233_v16 = vlaneseq  ;;  %vm209_vm2 = vcmask 60416   ;;  %s1811_s5 = inlined_call_operand.vmem [shape: f32[112,32], index: 5, kind: input, shape index: {}]   ;;  %s1812_s0 = inlined_call_operand.vmem [shape: f32[32,8], index: 0, kind: input, shape index: {}]   ;;  %s1813_s1 = inlined_call_operand.vmem [shape: f32[60,32], index: 1, kind: input, shape index: {}]   ;;  %s1814_s2 = inlined_call_operand.vmem [shape: f32[60,32], index: 2, kind: input, shape index: {}]   ;;  %s1815_s3 = inlined_call_operand.vmem [shape: f32[32,60], index: 3, kind: input, shape index: {}]   ;;  %s1816_s4 = inlined_call_operand.vmem [shape: f32[2,32], index: 4, kind: input, shape index: {}]   ;;  %s1817_s6 = inlined_call_operand.vmem [shape: f32[2,1], index: 6, kind: output, shape index: {}]  }
   0x1   :  { %v27_v0 = vld [vmem:[%s1811_s5] sm:$0xff]  ;;  %v24_v2 = vld [vmem:[%s1812_s0 + $0x8] sm:$0xff]  ;;  %v25_v3 = vld [vmem:[%s1812_s0 + $0x10] sm:$0xff]  ;;  %vm471_vm3 = vcmask 490496   ;;  %vm484_vm4 = vcmask 1043456   ;;  %vm1458_vm5 = vmmov 1  }
   0x2   :  { %v23_v1 = vld [vmem:[%s1812_s0] sm:$0xff]  ;;  %1225 = vmatprep.subr.mxu1 %v27_v0  ;;  %v26_v4 = vld [vmem:[%s1812_s0 + $0x18] sm:$0xff]  ;;  %v42_v8 = vld [vmem:[%s1813_s1 + $0x8] sm:$0xff]  ;;  %v1555_v17 = vshrl.u32 %v233_v16, 7  ;;  %vm1460_vm7 = vmmov 0   ;;  %vm1062_vm8 = vcmask 254976  }
   0x3   :  { %1227 = vmatprep.mubr.msk.f32.mxu1 %vm187_vm0, %v23_v1  ;;  %v1356_v5 = vpack.c.bf16 %v24_v2, %v23_v1  ;;  %v41_v6 = vld [vmem:[%s1813_s1] sm:$0xff]  ;;  %1226 = vmatpush3.msra.mxu1 %v27_v0  ;;  %v1360_v7 = vpack.c.bf16 %v26_v4, %v25_v3  ;;  %v43_v9 = vld [vmem:[%s1813_s1 + $0x10] sm:$0xff]  ;;  %v44_v10 = vld [vmem:[%s1813_s1 + $0x18] sm:$0xff]  ;;  %vm1066_vm9 = vcmask 1024  }
   0x4   :  { %1213 = vmatprep.mubr.msk.f32.mxu0 %vm49_vm1, %v41_v6  ;;  %1228 = vmatmul.mubr.msk.f32.vlgmr.msra.gmra.mrb[0].mxu1 %vm187_vm0, %v24_v2  ;;  %v45_v11 = vld [vmem:[%s1813_s1 + $0x20] sm:$0xff]  ;;  %v46_v12 = vld [vmem:[%s1813_s1 + $0x28] sm:$0xff]  ;;  %v47_v13 = vld [vmem:[%s1813_s1 + $0x30] sm:$0xff]  ;;  %v235_v18 = vsub.s32 0, %v1555_v17 }
   0x5   :  { %1357 = vmatprep.subr.bf16.mxu0 %v1356_v5  ;;  %1230 = vmatprep.mubr.msk.f32.mxu1 %vm187_vm0, %v25_v3  ;;  %v48_v14 = vld [vmem:[%s1813_s1 + $0x38] sm:$0xf]  ;;  %v1551_v15 = vld [vmem:[%s1814_s2] sm:$0xff]  ;;  %v1561_v19 = vld [vmem:[%s1811_s5 + $0x68] sm:$0xff] }
   0x6   :  { %1359 = vmatpush3.bf16.msra.mxu0 %v1356_v5  ;;  %v236_v20 = vrot.slane %v1561_v19, %v235_v18  ;;  %v1579_v35 = vld [vmem:[%s1814_s2 + $0x8] sm:$0xff]  ;;  %v1584_v36 = vld [vmem:[%s1814_s2 + $0x10] sm:$0xff]  ;;  %v1595_v43 = vld [vmem:[%s1814_s2 + $0x18] sm:$0xff] }
   0x7   :  { %1361 = vmatprep.subr.bf16.mxu0 %v1360_v7  ;;  %v1601_v45 = vld [vmem:[%s1814_s2 + $0x20] sm:$0xff]  ;;  %v1611_v51 = vld [vmem:[%s1814_s2 + $0x28] sm:$0xff]  ;;  %v1616_v52 = vld [vmem:[%s1814_s2 + $0x30] sm:$0xff] }
   0x8   :  { %1231 = vmatmul.mubr.msk.f32.gmra.mrb[2].mxu1 %vm187_vm0, %v26_v4  ;;  %v1627_v59 = vld [vmem:[%s1814_s2 + $0x38] sm:$0xf]  ;;  %v1635_v62 = vld [vmem:[%s1815_s3] sm:$0xff]  ;;  %v28_v63 = vld [vmem:[%s1811_s5 + $0x8] sm:$0xff] }
   0x9   :  { %1241 = vmatprep.mubr.msk.f32.mxu1 %vm49_vm1, %v1551_v15  ;;  %v29_v0 = vld [vmem:[%s1811_s5 + $0x10] sm:$0xff]  ;;  %v30_v1 = vld [vmem:[%s1811_s5 + $0x18] sm:$0xff]  ;;  %v31_v3 = vld [vmem:[%s1811_s5 + $0x20] sm:$0xff] }
   0xa   :  { %1363 = vmatpush3.bf16.msra.mxu0 %v1360_v7  ;;  %v1390_v2 = vpack.c.bf16 %v29_v0, %v28_v63  ;;  %v1394_v4 = vpack.c.bf16 %v31_v3, %v30_v1  ;;  %vm1675_vm6 = vmpackc.low %vm484_vm4, %vm1458_vm5 }
   0xd   :  { %1214 = vmatmul.mubr.msk.f32.vlgmr.msra.gmra.mrb[0].mxu0 %vm49_vm1, %v42_v8 }
   0xe   :  { %1216 = vmatprep.mubr.msk.f32.mxu0 %vm49_vm1, %v43_v9 }
  0x11   :  { %1217 = vmatmul.mubr.msk.f32.gmra.mrb[2].mxu0 %vm49_vm1, %v44_v10 }
  0x12   :  { %1219 = vmatprep.mubr.msk.f32.mxu0 %vm49_vm1, %v45_v11 }
  0x15   :  { %1220 = vmatmul.mubr.msk.f32.gmra.mrb[4].mxu0 %vm49_vm1, %v46_v12 }
  0x16   :  { %1222 = vmatprep.mubr.msk.f32.mxu0 %vm49_vm1, %v47_v13 }
  0x19   :  { %1223 = vmatmul.mubr.msk.f32.gmra.mrb[6].mxu0 %vm49_vm1, %v48_v14 }
  0x1a   :  { %1269 = vmatprep.mubr.msk.f32.mxu0 %vm471_vm3, %v1635_v62 }
  0xd7   :  { %v1229_v21 = vpop.f32.mrb[0].mxu1 }
  0xd8   :  { %v1564_v22 = vadd.f32 %v1229_v21, %v236_v20  ;;  %v315_v23 = vpop.f32.mrb[1].mxu1 }
  0xd9   :  { %v1566_v24 = vadd.f32 %v315_v23, %v236_v20 }
  0xdb   :  { %v1364_v25 = vpack.c.bf16 %v1564_v22, %v1566_v24  ;;  %v1232_v26 = vpop.f32.mrb[2].mxu1 }
  0xdc   :  { %v1570_v27 = vadd.f32 %v1232_v26, %v236_v20  ;;  %v325_v28 = vpop.f32.mrb[3].mxu1 }
  0xdd   :  { %v1572_v29 = vadd.f32 %v325_v28, %v236_v20  ;;  %1365 = vmatprep.subr.bf16.mxu1 %v1364_v25 }
  0xde   :  { %1367 = vmatpush3.bf16.msra.mxu1 %v1364_v25 }
  0xdf   :  { %v1368_v30 = vpack.c.bf16 %v1570_v27, %v1572_v29 }
  0xe0   :  { %v1215_v31 = vpop.f32.mrb[0].mxu0 }
  0xe1   :  { %v140_v32 = vpop.f32.mrb[1].mxu0  ;;  %1369 = vmatprep.subr.bf16.mxu1 %v1368_v30  ;;  %v180_v33 = vmul.f32 %v1215_v31, %v1215_v31 }
  0xe2   :  { %v179_v34 = vmul.f32 %v140_v32, %v140_v32  ;;  %1371 = vmatpush3.bf16.msra.mxu1 %v1368_v30 }
  0xe3   :  { %v191_v41 = vsel %vm187_vm0, %v180_v33, 0.0  ;;  %1391 = vmatprep.subr.bf16.mxu1 %v1390_v2 }
  0xe4   :  { %v188_v37 = vsel %vm187_vm0, %v179_v34, 0.0  ;;  %v1218_v38 = vpop.f32.mrb[2].mxu0 }
  0xe5   :  { %189 = vadd.xlane.f32.xlu0 %v188_v37  ;;  %v182_v39 = vmul.f32 %v1218_v38, %v1218_v38  ;;  %v150_v40 = vpop.f32.mrb[3].mxu0  ;;  %1242 = vmatmul.mubr.msk.f32.vlgmr.msra.gmra.mrb[4].mxu1 %vm49_vm1, %v1579_v35 }
  0xe6   :  { %v181_v42 = vmul.f32 %v150_v40, %v150_v40  ;;  %1244 = vmatprep.mubr.msk.f32.mxu1 %vm49_vm1, %v1584_v36  ;;  %1393 = vmatpush3.bf16.msra.mxu1 %v1390_v2 }
  0xe7   :  { %v197_v44 = vsel %vm187_vm0, %v182_v39, 0.0  ;;  %1395 = vmatprep.subr.bf16.mxu1 %v1394_v4 }
  0xe8   :  { %198 = vadd.xlane.f32.xlu1 %v197_v44  ;;  %v1221_v46 = vpop.f32.mrb[4].mxu0  ;;  %v194_v47 = vsel %vm187_vm0, %v181_v42, 0.0 }
  0xe9   :  { %192 = vadd.xlane.f32.xlu0 %v191_v41  ;;  %v184_v48 = vmul.f32 %v1221_v46, %v1221_v46  ;;  %v160_v49 = vpop.f32.mrb[5].mxu0  ;;  %1245 = vmatmul.mubr.msk.f32.gmra.mrb[6].mxu1 %vm49_vm1, %v1595_v43 }
  0xea   :  { %v183_v50 = vmul.f32 %v160_v49, %v160_v49  ;;  %1247 = vmatprep.mubr.msk.f32.mxu1 %vm49_vm1, %v1601_v45  ;;  %1397 = vmatpush3.bf16.msra.mxu1 %v1394_v4 }
  0xeb   :  { %v203_v56 = vsel %vm187_vm0, %v184_v48, 0.0 }
  0xec   :  { %195 = vadd.xlane.f32.xlu1 %v194_v47  ;;  %v1224_v53 = vpop.f32.mrb[6].mxu0  ;;  %v200_v54 = vsel %vm187_vm0, %v183_v50, 0.0 }
  0xed   :  { %v186_v55 = vmul.f32 %v1224_v53, %v1224_v53  ;;  %201 = vadd.xlane.f32.xlu0 %v200_v54  ;;  %v170_v57 = vpop.f32.mrb[7].mxu0  ;;  %1248 = vmatmul.mubr.msk.f32.gmra.mrb[8].mxu1 %vm49_vm1, %v1611_v51 }
  0xee   :  { %v185_v58 = vmul.f32 %v170_v57, %v170_v57  ;;  %1250 = vmatprep.mubr.msk.f32.mxu1 %vm49_vm1, %v1616_v52  ;;  %v1700_v57 = vld [vmem:[%s1815_s3 + $0x18] sm:$0xff] }
  0xef   :  { %v210_v61 = vsel %vm209_vm2, %v186_v55, 0.0  ;;  %v1686_v55 = vld [vmem:[%s1815_s3 + $0x8] sm:$0xff] }
  0xf0   :  { %204 = vadd.xlane.f32.xlu1 %v203_v56  ;;  %v206_v60 = vsel %vm187_vm0, %v185_v58, 0.0  ;;  %v1691_v56 = vld [vmem:[%s1815_s3 + $0x10] sm:$0xff] }
  0xf1   :  { %207 = vadd.xlane.f32.xlu0 %v206_v60  ;;  %1251 = vmatmul.mubr.msk.f32.gmra.mrb[10].mxu1 %vm49_vm1, %v1627_v59 }
  0xf4   :  { %211 = vadd.xlane.f32.xlu1 %v210_v61 }
 0x172   :  { %v190_v5 = vpop.xlane.xlu0 %189 }
 0x175   :  { %v199_v6 = vpop.xlane.xlu1 %198 }
 0x176   :  { %v193_v7 = vpop.xlane.xlu0 %192 }
 0x177   :  { %1442 = vrsqrt.f32 %v193_v7 }
 0x178   :  { %1444 = vrsqrt.f32 %v190_v5 }
 0x179   :  { %v196_v8 = vpop.xlane.xlu1 %195  ;;  %1446 = vrsqrt.f32 %v199_v6 }
 0x17a   :  { %v202_v10 = vpop.xlane.xlu0 %201  ;;  %1448 = vrsqrt.f32 %v196_v8 }
 0x17d   :  { %v205_v9 = vpop.xlane.xlu1 %204 }
 0x17e   :  { %1450 = vrsqrt.f32 %v205_v9  ;;  %v208_v12 = vpop.xlane.xlu0 %207 }
 0x17f   :  { %1452 = vrsqrt.f32 %v202_v10 }
 0x181   :  { %v212_v11 = vpop.xlane.xlu1 %211  ;;  %v1651_v13 = vpop.eup %1442 }
 0x182   :  { %1454 = vrsqrt.f32 %v212_v11  ;;  %v1653_v16 = vpop.eup %1444 }
 0x183   :  { %1456 = vrsqrt.f32 %v208_v12  ;;  %v1657_v23 = vpop.eup %1446 }
 0x184   :  { %v1659_v28 = vpop.eup %1448 }
 0x188   :  { %v1662_v32 = vpop.eup %1450 }
 0x189   :  { %v1665_v34 = vpop.eup %1452 }
 0x18c   :  { %v1668_v41 = vpop.eup %1454 }
 0x18d   :  { %v1671_v44 = vpop.eup %1456 }
 0x1b8   :  { %v1243_v14 = vpop.f32.mrb[4].mxu1 }
 0x1b9   :  { %v464_v18 = vmul.f32 %v1651_v13, %v1243_v14  ;;  %v424_v20 = vpop.f32.mrb[5].mxu1 }
 0x1ba   :  { %v463_v21 = vmul.f32 %v1653_v16, %v424_v20 }
 0x1bc   :  { %v1372_v25 = vpack.c.bf16 %v464_v18, %v463_v21  ;;  %v1246_v26 = vpop.f32.mrb[6].mxu1 }
 0x1bd   :  { %v466_v30 = vmul.f32 %v1657_v23, %v1246_v26  ;;  %v434_v31 = vpop.f32.mrb[7].mxu1 }
 0x1be   :  { %v465_v33 = vmul.f32 %v1659_v28, %v434_v31  ;;  %1373 = vmatprep.subr.bf16.mxu0 %v1372_v25 }
 0x1bf   :  { %1375 = vmatpush3.bf16.msra.mxu0 %v1372_v25 }
 0x1c0   :  { %v1376_v37 = vpack.c.bf16 %v466_v30, %v465_v33  ;;  %v1249_v38 = vpop.f32.mrb[8].mxu1 }
 0x1c1   :  { %v468_v39 = vmul.f32 %v1662_v32, %v1249_v38  ;;  %v444_v40 = vpop.f32.mrb[9].mxu1 }
 0x1c2   :  { %v467_v42 = vmul.f32 %v1665_v34, %v444_v40  ;;  %1377 = vmatprep.subr.bf16.mxu0 %v1376_v37 }
 0x1c3   :  { %1379 = vmatpush3.bf16.msra.mxu0 %v1376_v37 }
 0x1c4   :  { %v1380_v46 = vpack.c.bf16 %v468_v39, %v467_v42  ;;  %v1252_v47 = vpop.f32.mrb[10].mxu1 }
 0x1c5   :  { %v470_v48 = vmul.f32 %v1668_v41, %v1252_v47  ;;  %v454_v49 = vpop.f32.mrb[11].mxu1 }
 0x1c6   :  { %v469_v50 = vmul.f32 %v1671_v44, %v454_v49  ;;  %1381 = vmatprep.subr.bf16.mxu0 %v1380_v46 }
 0x1c7   :  { %1383 = vmatpush3.bf16.msra.mxu0 %v1380_v46 }
 0x1c8   :  { %v1384_v54 = vpack.c.bf16 %v470_v48, %v469_v50 }
 0x1ca   :  { %1386 = vmatprep.subr.msk.bf16.mxu0 %vm1675_vm6, %v1384_v54 }
 0x1cb   :  { %1389 = vmatpush3.bf16.msk.msra.mxu0 %vm1675_vm6, %v1384_v54  ;;  %v1459_v54 = vmov 0.0|0.0  }
 0x1ce   :  { %1270 = vmatmul.mubr.msk.f32.vlgmr.msra.gmra.mrb[8].mxu0 %vm471_vm3, %v1686_v55 }
 0x1cf   :  { %1272 = vmatprep.mubr.msk.f32.mxu0 %vm471_vm3, %v1691_v56 }
 0x1d2   :  { %1273 = vmatmul.mubr.msk.f32.gmra.mrb[10].mxu0 %vm471_vm3, %v1700_v57 }
 0x1d3   :  { %1297 = vmatprep.mubr.msk.f32.mxu0 %vm49_vm1, %v1551_v15  ;;  %v575_v15 = vsub.s32 1, %v1555_v17 }
 0x2a1   :  { %v1271_v58 = vpop.f32.mrb[8].mxu0 }
 0x2a2   :  { %v554_v60 = vpop.f32.mrb[9].mxu0  ;;  %v560_v63 = vadd.f32 %v1271_v58, %v1564_v22  ;;  %v576_v22 = vrot.slane %v1561_v19, %v575_v15 }
 0x2a3   :  { %v555_v61 = vadd.f32 %v554_v60, %v1566_v24 }
 0x2a5   :  { %v1274_v0 = vpop.f32.mrb[10].mxu0  ;;  %1283 = vmatprep.mubr.msk.f32.mxu1 %vm49_vm1, %v555_v61 }
 0x2a6   :  { %v564_v1 = vpop.f32.mrb[11].mxu0  ;;  %1284 = vmatmul.mubr.msk.f32.vlgmr.msra.gmra.mrb[12].mxu1 %vm49_vm1, %v560_v63  ;;  %v570_v3 = vadd.f32 %v1274_v0, %v1570_v27  ;;  %v37_v63 = vld [vmem:[%s1811_s5 + $0x50] sm:$0xff] }
 0x2a7   :  { %v565_v2 = vadd.f32 %v564_v1, %v1572_v29 }
 0x2a9   :  { %1286 = vmatprep.mubr.msk.f32.mxu1 %vm49_vm1, %v565_v2  ;;  %v36_v2 = vld [vmem:[%s1811_s5 + $0x48] sm:$0xff] }
 0x2aa   :  { %1287 = vmatmul.mubr.msk.f32.gmra.mrb[14].mxu1 %vm49_vm1, %v570_v3 }
 0x2ab   :  { %1325 = vmatprep.mubr.msk.f32.mxu1 %vm471_vm3, %v1635_v62 }
 0x379   :  { %v1285_v24 = vpop.f32.mrb[12].mxu1 }
 0x37a   :  { %v1718_v4 = vadd.f32 %v1285_v24, %v576_v22  ;;  %v655_v5 = vpop.f32.mrb[13].mxu1 }
 0x37b   :  { %v1720_v6 = vadd.f32 %v655_v5, %v576_v22 }
 0x37c   :  { %v675_v29 = vmax.f32 %v1718_v4, 0.0 }
 0x37d   :  { %v674_v27 = vmax.f32 %v1720_v6, 0.0  ;;  %v1288_v7 = vpop.f32.mrb[14].mxu1 }
 0x37e   :  { %v1724_v8 = vadd.f32 %v1288_v7, %v576_v22  ;;  %v665_v9 = vpop.f32.mrb[15].mxu1 }
 0x37f   :  { %v1398_v62 = vpack.c.bf16 %v675_v29, %v674_v27  ;;  %v1730_v10 = vadd.f32 %v665_v9, %v576_v22 }
 0x380   :  { %v677_v11 = vmax.f32 %v1724_v8, 0.0 }
 0x381   :  { %v676_v12 = vmax.f32 %v1730_v10, 0.0  ;;  %1399 = vmatprep.subr.bf16.mxu0 %v1398_v62  ;;  %v984_v10 = vld [vmem:[%s1816_s4] sm:$0x3] }
 0x382   :  { %1401 = vmatpush3.bf16.msra.mxu0 %v1398_v62 }
 0x383   :  { %v1402_v14 = vpack.c.bf16 %v677_v11, %v676_v12 }
 0x385   :  { %1403 = vmatprep.subr.bf16.mxu0 %v1402_v14 }
 0x386   :  { %1405 = vmatpush3.bf16.msra.mxu0 %v1402_v14 }
 0x389   :  { %1298 = vmatmul.mubr.msk.f32.vlgmr.msra.gmra.mrb[12].mxu0 %vm49_vm1, %v1579_v35  ;;  %v32_v35 = vld [vmem:[%s1811_s5 + $0x28] sm:$0xff] }
 0x38a   :  { %1300 = vmatprep.mubr.msk.f32.mxu0 %vm49_vm1, %v1584_v36  ;;  %v33_v36 = vld [vmem:[%s1811_s5 + $0x30] sm:$0xff] }
 0x38d   :  { %1301 = vmatmul.mubr.msk.f32.gmra.mrb[14].mxu0 %vm49_vm1, %v1595_v43  ;;  %v34_v43 = vld [vmem:[%s1811_s5 + $0x38] sm:$0xff] }
 0x38e   :  { %1303 = vmatprep.mubr.msk.f32.mxu0 %vm49_vm1, %v1601_v45  ;;  %v1424_v45 = vpack.c.bf16 %v33_v36, %v32_v35 }
 0x390   :  { %1425 = vmatprep.subr.bf16.mxu0 %v1424_v45 }
 0x391   :  { %1304 = vmatmul.mubr.msk.f32.gmra.mrb[16].mxu0 %vm49_vm1, %v1611_v51  ;;  %v35_v51 = vld [vmem:[%s1811_s5 + $0x40] sm:$0xff] }
 0x392   :  { %1306 = vmatprep.mubr.msk.f32.mxu0 %vm49_vm1, %v1616_v52  ;;  %v1428_v52 = vpack.c.bf16 %v35_v51, %v34_v43  ;;  %1427 = vmatpush3.bf16.msra.mxu0 %v1424_v45 }
 0x394   :  { %1429 = vmatprep.subr.bf16.mxu0 %v1428_v52 }
 0x395   :  { %1307 = vmatmul.mubr.msk.f32.gmra.mrb[18].mxu0 %vm49_vm1, %v1627_v59 }
 0x396   :  { %1431 = vmatpush3.bf16.msra.mxu0 %v1428_v52 }
 0x45c   :  { %v1299_v59 = vpop.f32.mrb[12].mxu0 }
 0x45d   :  { %v784_v18 = vmul.f32 %v1651_v13, %v1299_v59  ;;  %v744_v20 = vpop.f32.mrb[13].mxu0 }
 0x45e   :  { %v783_v21 = vmul.f32 %v1653_v16, %v744_v20 }
 0x460   :  { %v1406_v25 = vpack.c.bf16 %v784_v18, %v783_v21  ;;  %v1302_v26 = vpop.f32.mrb[14].mxu0 }
 0x461   :  { %v786_v30 = vmul.f32 %v1657_v23, %v1302_v26  ;;  %v754_v31 = vpop.f32.mrb[15].mxu0 }
 0x462   :  { %v785_v33 = vmul.f32 %v1659_v28, %v754_v31  ;;  %1407 = vmatprep.subr.bf16.mxu1 %v1406_v25 }
 0x463   :  { %1409 = vmatpush3.bf16.msra.mxu1 %v1406_v25 }
 0x464   :  { %v1410_v37 = vpack.c.bf16 %v786_v30, %v785_v33  ;;  %v1305_v38 = vpop.f32.mrb[16].mxu0 }
 0x465   :  { %v788_v39 = vmul.f32 %v1662_v32, %v1305_v38  ;;  %v764_v40 = vpop.f32.mrb[17].mxu0 }
 0x466   :  { %v787_v42 = vmul.f32 %v1665_v34, %v764_v40  ;;  %1411 = vmatprep.subr.bf16.mxu1 %v1410_v37 }
 0x467   :  { %1413 = vmatpush3.bf16.msra.mxu1 %v1410_v37 }
 0x468   :  { %v1414_v13 = vpack.c.bf16 %v788_v39, %v787_v42  ;;  %v1308_v16 = vpop.f32.mrb[18].mxu0 }
 0x469   :  { %v790_v46 = vmul.f32 %v1668_v41, %v1308_v16  ;;  %v774_v47 = vpop.f32.mrb[19].mxu0 }
 0x46a   :  { %v789_v23 = vmul.f32 %v1671_v44, %v774_v47  ;;  %1415 = vmatprep.subr.bf16.mxu1 %v1414_v13 }
 0x46b   :  { %1417 = vmatpush3.bf16.msra.mxu1 %v1414_v13 }
 0x46c   :  { %v1418_v28 = vpack.c.bf16 %v790_v46, %v789_v23 }
 0x46e   :  { %1420 = vmatprep.subr.msk.bf16.mxu1 %vm1675_vm6, %v1418_v28 }
 0x46f   :  { %1423 = vmatpush3.bf16.msk.msra.mxu1 %vm1675_vm6, %v1418_v28 }
 0x470   :  { %1432 = vmatprep.subr.bf16.mxu1 %v1459_v54 }
 0x472   :  { %1326 = vmatmul.mubr.msk.f32.vlgmr.msra.gmra.mrb[16].mxu1 %vm471_vm3, %v1686_v55  ;;  %v1461_v55 = vmov 0.0  }
 0x473   :  { %1328 = vmatprep.mubr.msk.f32.mxu1 %vm471_vm3, %v1691_v56  ;;  %v881_v56 = vsub.s32 2, %v1555_v17 }
 0x476   :  { %1329 = vmatmul.mubr.msk.f32.gmra.mrb[18].mxu1 %vm471_vm3, %v1700_v57  ;;  %v882_v57 = vrot.slane %v1561_v19, %v881_v56  ;;  %v39_v19 = vld [vmem:[%s1811_s5 + $0x60] sm:$0xff] }
 0x477   :  { %1353 = vmatprep.mubr.msk.f32.mxu1 %vm1460_vm7, %v1461_v55 }
 0x545   :  { %v1327_v32 = vpop.f32.mrb[16].mxu1 }
 0x546   :  { %v860_v34 = vpop.f32.mrb[17].mxu1  ;;  %v866_v44 = vadd.f32 %v1327_v32, %v675_v29  ;;  %v38_v29 = vld [vmem:[%s1811_s5 + $0x58] sm:$0xff] }
 0x547   :  { %v861_v41 = vadd.f32 %v860_v34, %v674_v27 }
 0x549   :  { %v1330_v48 = vpop.f32.mrb[18].mxu1  ;;  %1339 = vmatprep.mubr.msk.f32.mxu0 %vm49_vm1, %v861_v41 }
 0x54a   :  { %v870_v49 = vpop.f32.mrb[19].mxu1  ;;  %1340 = vmatmul.mubr.msk.f32.vlgmr.msra.gmra.mrb[20].mxu0 %vm49_vm1, %v866_v44  ;;  %v876_v53 = vadd.f32 %v1330_v48, %v677_v11 }
 0x54b   :  { %v871_v50 = vadd.f32 %v870_v49, %v676_v12 }
 0x54d   :  { %1342 = vmatprep.mubr.msk.f32.mxu0 %vm49_vm1, %v871_v50 }
 0x54e   :  { %1343 = vmatmul.mubr.msk.f32.gmra.mrb[22].mxu0 %vm49_vm1, %v876_v53 }
 0x61d   :  { %v1341_v58 = vpop.f32.mrb[20].mxu0 }
 0x61e   :  { %v967_v60 = vadd.f32 %v1341_v58, %v882_v57  ;;  %v961_v61 = vpop.f32.mrb[21].mxu0 }
 0x61f   :  { %v962_v0 = vadd.f32 %v961_v61, %v882_v57 }
 0x620   :  { %v981_v1 = vmax.f32 %v967_v60, 0.0 }
 0x621   :  { %v980_v3 = vmax.f32 %v962_v0, 0.0  ;;  %v1344_v15 = vpop.f32.mrb[22].mxu0 }
 0x622   :  { %v986_v22 = vmul.f32 %v981_v1, %v37_v63  ;;  %v977_v24 = vadd.f32 %v1344_v15, %v882_v57  ;;  %v971_v17 = vpop.f32.mrb[23].mxu0 }
 0x623   :  { %v985_v4 = vmul.f32 %v980_v3, %v36_v2  ;;  %v972_v5 = vadd.f32 %v971_v17, %v882_v57 }
 0x624   :  { %v983_v6 = vmax.f32 %v977_v24, 0.0 }
 0x625   :  { %v1433_v27 = vpack.c.bf16 %v986_v22, %v985_v4  ;;  %v982_v7 = vmax.f32 %v972_v5, 0.0 }
 0x626   :  { %v988_v8 = vmul.f32 %v983_v6, %v39_v19 }
 0x627   :  { %v987_v9 = vmul.f32 %v982_v7, %v38_v29  ;;  %1434 = vmatpush3.bf16.msra.mxu1 %v1433_v27 }
 0x628   :  { %1435 = vmatprep.subr.bf16.mxu1 %v1459_v54 }
 0x629   :  { %v1436_v62 = vpack.c.bf16 %v988_v8, %v987_v9 }
 0x62b   :  { %1437 = vmatpush3.bf16.msra.mxu1 %v1436_v62 }
 0x62e   :  { %1354 = vmatmul.mubr.msk.f32.vlgmr.msra.gmra.mrb[20].mxu1 %vm49_vm1, %v984_v10 }
 0x701   :  { %v1058_v11 = vpop.f32.mrb[20].mxu1 }
 0x702   :  { %v1355_v12 = vpop.f32.mrb[21].mxu1  ;;  %v1063_v14 = vsel %vm1062_vm8, %v1058_v11, 0.0 }
 0x703   :  { %1064 = vadd.xlane.f32.xlu0 %v1063_v14 }
 0x790   :  { %v1065_v35 = vpop.xlane.xlu0 %1064 }
 0x791   :  { %1067 = vst.msk [vmem:[%s1817_s6] sm:$0x3] %vm1066_vm9, %v1065_v35 }

</bundles_post_ra>
